<compile_context>
chip_gen: v6e
topology: v6e:2x2x1
jax: 0.10.0
libtpu: 0.0.40
codegen_flags: <defaults>
</compile_context>

<pallas_src>
import jax
import jax.numpy as jnp
from jax.experimental import pallas as pl
from jax.experimental.pallas import tpu as pltpu


# --------------------------------------------------------------------------- #
# Kernel
# --------------------------------------------------------------------------- #
def critic_kernel(state_ref, action_ref,
                  w1s_ref, w1a_ref, b1_ref,
                  w2_ref, b2_ref,
                  w3_ref, b3_ref,
                  w4_ref, b4_ref,
                  wq_ref, bq_ref,
                  out_ref):
    """Forward pass of the Critic MLP for one batch tile (all weights VMEM-resident)."""
    s = state_ref[...].astype(jnp.bfloat16)
    a = action_ref[...].astype(jnp.bfloat16)

    # Layer 1: concat(state, action) @ W1 + b1  ==  s @ W1_s + a @ W1_a + b1
    h = (jnp.dot(s, w1s_ref[...], preferred_element_type=jnp.float32)
         + jnp.dot(a, w1a_ref[...], preferred_element_type=jnp.float32)
         + b1_ref[...])
    h = jnp.maximum(h, 0.0)

    # Layers 2-4: bf16 MXU matmuls with f32 accumulation, f32 bias + ReLU.
    for w_ref, b_ref in ((w2_ref, b2_ref), (w3_ref, b3_ref), (w4_ref, b4_ref)):
        h = jnp.dot(h.astype(jnp.bfloat16), w_ref[...],
                    preferred_element_type=jnp.float32) + b_ref[...]
        h = jnp.maximum(h, 0.0)

    # Final (density -> 1) layer as VPU multiply + lane reduce (no MXU pass).
    q = jnp.sum(h * wq_ref[...], axis=-1, keepdims=True) + bq_ref[...]
    out_ref[...] = q.astype(out_ref.dtype)


# --------------------------------------------------------------------------- #
# Wrapper
# --------------------------------------------------------------------------- #
def _pick_batch_tile(batch, max_tb=1024):
    """Largest tile <= max_tb that evenly divides the batch (keeps blocks exact)."""
    if batch <= max_tb:
        return batch
    for tb in (max_tb, 512, 256, 128, 64, 32, 16, 8):
        if batch % tb == 0:
            return tb
    return batch  # fall back to a single block


def critic_forward(state, action, kparams, max_tb=1024):
    """Run the Pallas Critic MLP. kparams = prepare_kernel_params(...)."""
    state = state.astype(jnp.float32)
    action = action.astype(jnp.float32)
    B, state_dim = state.shape
    action_dim = action.shape[1]
    in_dim = state_dim + action_dim
    density = kparams[2].shape[1]          # b1 is (1, density)

    tb = _pick_batch_tile(B, max_tb)
    grid = (B // tb,)

    def batched_spec(d):
        return pl.BlockSpec((tb, d), lambda i: (i, 0))

    def resident_spec(arr):
        # Constant block index across the grid -> weights stay in VMEM, no re-DMA.
        return pl.BlockSpec(arr.shape, lambda i: (0, 0))

    in_specs = ([batched_spec(state_dim), batched_spec(action_dim)]
                + [resident_spec(p) for p in kparams])
    out_spec = pl.BlockSpec((tb, 1), lambda i: (i, 0))

    weight_bytes = sum(int(p.size) * p.dtype.itemsize for p in kparams)
    io_bytes = B * (in_dim + 1) * 4
    flops = (2 * B * in_dim * density          # layer 1
             + 3 * 2 * B * density * density   # layers 2-4
             + 2 * B * density)                # final reduce
    cost = pl.CostEstimate(flops=flops, transcendentals=0,
                           bytes_accessed=weight_bytes + io_bytes)

    # VMEM budget: resident weights + f32 activation temporaries + double-buffered I/O.
    vmem_needed = (weight_bytes
                   + 4 * tb * density * 4
                   + 2 * 2 * tb * (in_dim + 1) * 4)
    vmem_limit = min(32 * 1024 * 1024, max(4 * 1024 * 1024, 2 * vmem_needed))

    return pl.pallas_call(
        critic_kernel,
        out_shape=jax.ShapeDtypeStruct((B, 1), jnp.float32),
        grid=grid,
        in_specs=in_specs,
        out_specs=out_spec,
        compiler_params=pltpu.CompilerParams(
            dimension_semantics=("parallel",),
            vmem_limit_bytes=int(vmem_limit)),
        cost_estimate=cost,
    )(state, action, *kparams)


# --------------------------------------------------------------------------- #
# Parameter construction (mirrors the PyTorch module's __init__)
# --------------------------------------------------------------------------- #
def init_critic_params(key, input_dim, density=256):
    """H1, H2, H3, Q: weight ~ N(0, 0.1), bias = 1.  H4: PyTorch default Linear init."""
    ks = jax.random.split(key, 6)

    def normal_layer(k, fan_in, fan_out):
        w = 0.1 * jax.random.normal(k, (fan_in, fan_out), dtype=jnp.float32)
        b = jnp.ones((1, fan_out), dtype=jnp.float32)
        return w, b

    def default_layer(kw, kb, fan_in, fan_out):
        bound = 1.0 / jnp.sqrt(jnp.float32(fan_in))
        w = jax.random.uniform(kw, (fan_in, fan_out), dtype=jnp.float32,
                               minval=-bound, maxval=bound)
        b = jax.random.uniform(kb, (1, fan_out), dtype=jnp.float32,
                               minval=-bound, maxval=bound)
        return w, b

    h1 = normal_layer(ks[0], input_dim, density)
    h2 = normal_layer(ks[1], density, density)
    h3 = normal_layer(ks[2], density, density)
    h4 = default_layer(ks[3], ks[4], density, density)   # H4 not in set_init -> default init
    q = normal_layer(ks[5], density, 1)
    return [h1, h2, h3, h4, q]
    # TODO(synk): Adam optimizer / checkpoint bookkeeping from Critic.__init__ is
    # training-loop state, not part of the forward pass, and is not translated.


def prepare_kernel_params(params, state_dim):
    """Split W1 by state/action, cast big weights to bf16, reshape Q weight to a row."""
    (w1, b1), (w2, b2), (w3, b3), (w4, b4), (wq, bq) = params
    w1s = w1[:state_dim].astype(jnp.bfloat16)
    w1a = w1[state_dim:].astype(jnp.bfloat16)
    return (w1s, w1a, b1.astype(jnp.float32),
            w2.astype(jnp.bfloat16), b2.astype(jnp.float32),
            w3.astype(jnp.bfloat16), b3.astype(jnp.float32),
            w4.astype(jnp.bfloat16), b4.astype(jnp.float32),
            wq.reshape(1, -1).astype(jnp.float32),
            bq.reshape(1, 1).astype(jnp.float32))


# --------------------------------------------------------------------------- #
# Pure-JAX reference (same bf16 quantization path as the kernel)
# --------------------------------------------------------------------------- #
def critic_reference(state, action, kparams):
    (w1s, w1a, b1, w2, b2, w3, b3, w4, b4, wq_row, bq) = kparams
    s = state.astype(jnp.bfloat16)
    a = action.astype(jnp.bfloat16)
    h = (jnp.dot(s, w1s, preferred_element_type=jnp.float32)
         + jnp.dot(a, w1a, preferred_element_type=jnp.float32) + b1)
    h = jnp.maximum(h, 0.0)
    for w, b in ((w2, b2), (w3, b3), (w4, b4)):
        h = jnp.maximum(jnp.dot(h.astype(jnp.bfloat16), w,
                                preferred_element_type=jnp.float32) + b, 0.0)
    return jnp.sum(h * wq_row, axis=-1, keepdims=True) + bq


# --------------------------------------------------------------------------- #
if __name__ == "__main__":
    key = jax.random.PRNGKey(0)
    k_state, k_action, k_params = jax.random.split(key, 3)

    batch = 2
    state_dim = 24
    action_dim = 8
    input_dim = state_dim + action_dim  # 32
    density = 256

    state = jax.random.normal(k_state, (batch, state_dim), dtype=jnp.float32)
    action = jax.random.normal(k_action, (batch, action_dim), dtype=jnp.float32)

    params = init_critic_params(k_params, input_dim, density)
    kparams = prepare_kernel_params(params, state_dim)

    q_pallas = critic_forward(state, action, kparams)
    jax.block_until_ready(q_pallas)

    q_ref = critic_reference(state, action, kparams)
    assert q_pallas.shape == (batch, 1), q_pallas.shape
    assert jnp.allclose(q_pallas, q_ref, rtol=1e-3, atol=1e-3), (q_pallas, q_ref)

    print("KERNEL_OK")
</pallas_src>

<mosaic_0001>
module attributes {stable_mosaic.version = 11 : i64} {
  func.func @critic_kernel(%arg0: i32, %arg1: memref<2x24xf32, #tpu.memory_space<vmem>>, %arg2: memref<2x8xf32, #tpu.memory_space<vmem>>, %arg3: memref<24x256xbf16, #tpu.memory_space<vmem>>, %arg4: memref<8x256xbf16, #tpu.memory_space<vmem>>, %arg5: memref<1x256xf32, #tpu.memory_space<vmem>>, %arg6: memref<256x256xbf16, #tpu.memory_space<vmem>>, %arg7: memref<1x256xf32, #tpu.memory_space<vmem>>, %arg8: memref<256x256xbf16, #tpu.memory_space<vmem>>, %arg9: memref<1x256xf32, #tpu.memory_space<vmem>>, %arg10: memref<256x256xbf16, #tpu.memory_space<vmem>>, %arg11: memref<1x256xf32, #tpu.memory_space<vmem>>, %arg12: memref<1x256xf32, #tpu.memory_space<vmem>>, %arg13: memref<1x1xf32, #tpu.memory_space<vmem>>, %arg14: memref<2x1xf32, #tpu.memory_space<vmem>>) attributes {dimension_semantics = [#tpu.dimension_semantics<parallel>], iteration_bounds = array<i64: 1>, scalar_prefetch = 0 : i64, scratch_operands = 0 : i64, tpu.core_type = #tpu.core_type<tc>, window_params = [{transform_indices = @transform_0, window_bounds = array<i64: 2, 24>}, {transform_indices = @transform_1, window_bounds = array<i64: 2, 8>}, {pipeline_mode = #tpu.pipeline_mode<synchronous>, transform_indices = @transform_2, window_bounds = array<i64: 24, 256>}, {pipeline_mode = #tpu.pipeline_mode<synchronous>, transform_indices = @transform_3, window_bounds = array<i64: 8, 256>}, {pipeline_mode = #tpu.pipeline_mode<synchronous>, transform_indices = @transform_4, window_bounds = array<i64: 1, 256>}, {pipeline_mode = #tpu.pipeline_mode<synchronous>, transform_indices = @transform_5, window_bounds = array<i64: 256, 256>}, {pipeline_mode = #tpu.pipeline_mode<synchronous>, transform_indices = @transform_6, window_bounds = array<i64: 1, 256>}, {pipeline_mode = #tpu.pipeline_mode<synchronous>, transform_indices = @transform_7, window_bounds = array<i64: 256, 256>}, {pipeline_mode = #tpu.pipeline_mode<synchronous>, transform_indices = @transform_8, window_bounds = array<i64: 1, 256>}, {pipeline_mode = #tpu.pipeline_mode<synchronous>, transform_indices = @transform_9, window_bounds = array<i64: 256, 256>}, {pipeline_mode = #tpu.pipeline_mode<synchronous>, transform_indices = @transform_10, window_bounds = array<i64: 1, 256>}, {pipeline_mode = #tpu.pipeline_mode<synchronous>, transform_indices = @transform_11, window_bounds = array<i64: 1, 256>}, {pipeline_mode = #tpu.pipeline_mode<synchronous>, transform_indices = @transform_12, window_bounds = array<i64: 1, 1>}, {transform_indices = @transform_13, window_bounds = array<i64: 2, 1>}]} {
    %c0 = arith.constant 0 : index
    %c0_0 = arith.constant 0 : index
    %0 = vector.load %arg1[%c0, %c0_0] : memref<2x24xf32, #tpu.memory_space<vmem>>, vector<2x24xf32>
    %1 = arith.truncf %0 : vector<2x24xf32> to vector<2x24xbf16>
    %c0_1 = arith.constant 0 : index
    %c0_2 = arith.constant 0 : index
    %2 = vector.load %arg2[%c0_1, %c0_2] : memref<2x8xf32, #tpu.memory_space<vmem>>, vector<2x8xf32>
    %3 = arith.truncf %2 : vector<2x8xf32> to vector<2x8xbf16>
    %c0_3 = arith.constant 0 : index
    %c0_4 = arith.constant 0 : index
    %4 = vector.load %arg3[%c0_3, %c0_4] : memref<24x256xbf16, #tpu.memory_space<vmem>>, vector<24x256xbf16>
    %cst = arith.constant dense<0.000000e+00> : vector<2x256xf32>
    %5 = tpu.matmul %1, %4, %cst {dimension_numbers = #tpu.dot_dimension_numbers<[1], [0], [0], [1], [0, 0, 1, 1], [], []>} : vector<2x24xbf16>, vector<24x256xbf16>, vector<2x256xf32> -> vector<2x256xf32>
    %c0_5 = arith.constant 0 : index
    %c0_6 = arith.constant 0 : index
    %6 = vector.load %arg4[%c0_5, %c0_6] : memref<8x256xbf16, #tpu.memory_space<vmem>>, vector<8x256xbf16>
    %cst_7 = arith.constant dense<0.000000e+00> : vector<2x256xf32>
    %7 = tpu.matmul %3, %6, %cst_7 {dimension_numbers = #tpu.dot_dimension_numbers<[1], [0], [0], [1], [0, 0, 1, 1], [], []>} : vector<2x8xbf16>, vector<8x256xbf16>, vector<2x256xf32> -> vector<2x256xf32>
    %8 = arith.addf %5, %7 : vector<2x256xf32>
    %c0_8 = arith.constant 0 : index
    %c0_9 = arith.constant 0 : index
    %9 = vector.load %arg5[%c0_8, %c0_9] : memref<1x256xf32, #tpu.memory_space<vmem>>, vector<1x256xf32>
    %10 = vector.broadcast %9 : vector<1x256xf32> to vector<2x256xf32>
    %11 = arith.addf %8, %10 : vector<2x256xf32>
    %cst_10 = arith.constant 0.000000e+00 : f32
    %12 = vector.broadcast %cst_10 : f32 to vector<2x256xf32>
    %13 = arith.maximumf %11, %12 : vector<2x256xf32>
    %14 = arith.truncf %13 : vector<2x256xf32> to vector<2x256xbf16>
    %c0_11 = arith.constant 0 : index
    %c0_12 = arith.constant 0 : index
    %15 = vector.load %arg6[%c0_11, %c0_12] : memref<256x256xbf16, #tpu.memory_space<vmem>>, vector<256x256xbf16>
    %cst_13 = arith.constant dense<0.000000e+00> : vector<2x256xf32>
    %16 = tpu.matmul %14, %15, %cst_13 {dimension_numbers = #tpu.dot_dimension_numbers<[1], [0], [0], [1], [0, 0, 1, 1], [], []>} : vector<2x256xbf16>, vector<256x256xbf16>, vector<2x256xf32> -> vector<2x256xf32>
    %c0_14 = arith.constant 0 : index
    %c0_15 = arith.constant 0 : index
    %17 = vector.load %arg7[%c0_14, %c0_15] : memref<1x256xf32, #tpu.memory_space<vmem>>, vector<1x256xf32>
    %18 = vector.broadcast %17 : vector<1x256xf32> to vector<2x256xf32>
    %19 = arith.addf %16, %18 : vector<2x256xf32>
    %cst_16 = arith.constant 0.000000e+00 : f32
    %20 = vector.broadcast %cst_16 : f32 to vector<2x256xf32>
    %21 = arith.maximumf %19, %20 : vector<2x256xf32>
    %22 = arith.truncf %21 : vector<2x256xf32> to vector<2x256xbf16>
    %c0_17 = arith.constant 0 : index
    %c0_18 = arith.constant 0 : index
    %23 = vector.load %arg8[%c0_17, %c0_18] : memref<256x256xbf16, #tpu.memory_space<vmem>>, vector<256x256xbf16>
    %cst_19 = arith.constant dense<0.000000e+00> : vector<2x256xf32>
    %24 = tpu.matmul %22, %23, %cst_19 {dimension_numbers = #tpu.dot_dimension_numbers<[1], [0], [0], [1], [0, 0, 1, 1], [], []>} : vector<2x256xbf16>, vector<256x256xbf16>, vector<2x256xf32> -> vector<2x256xf32>
    %c0_20 = arith.constant 0 : index
    %c0_21 = arith.constant 0 : index
    %25 = vector.load %arg9[%c0_20, %c0_21] : memref<1x256xf32, #tpu.memory_space<vmem>>, vector<1x256xf32>
    %26 = vector.broadcast %25 : vector<1x256xf32> to vector<2x256xf32>
    %27 = arith.addf %24, %26 : vector<2x256xf32>
    %cst_22 = arith.constant 0.000000e+00 : f32
    %28 = vector.broadcast %cst_22 : f32 to vector<2x256xf32>
    %29 = arith.maximumf %27, %28 : vector<2x256xf32>
    %30 = arith.truncf %29 : vector<2x256xf32> to vector<2x256xbf16>
    %c0_23 = arith.constant 0 : index
    %c0_24 = arith.constant 0 : index
    %31 = vector.load %arg10[%c0_23, %c0_24] : memref<256x256xbf16, #tpu.memory_space<vmem>>, vector<256x256xbf16>
    %cst_25 = arith.constant dense<0.000000e+00> : vector<2x256xf32>
    %32 = tpu.matmul %30, %31, %cst_25 {dimension_numbers = #tpu.dot_dimension_numbers<[1], [0], [0], [1], [0, 0, 1, 1], [], []>} : vector<2x256xbf16>, vector<256x256xbf16>, vector<2x256xf32> -> vector<2x256xf32>
    %c0_26 = arith.constant 0 : index
    %c0_27 = arith.constant 0 : index
    %33 = vector.load %arg11[%c0_26, %c0_27] : memref<1x256xf32, #tpu.memory_space<vmem>>, vector<1x256xf32>
    %34 = vector.broadcast %33 : vector<1x256xf32> to vector<2x256xf32>
    %35 = arith.addf %32, %34 : vector<2x256xf32>
    %cst_28 = arith.constant 0.000000e+00 : f32
    %36 = vector.broadcast %cst_28 : f32 to vector<2x256xf32>
    %37 = arith.maximumf %35, %36 : vector<2x256xf32>
    %c0_29 = arith.constant 0 : index
    %c0_30 = arith.constant 0 : index
    %38 = vector.load %arg12[%c0_29, %c0_30] : memref<1x256xf32, #tpu.memory_space<vmem>>, vector<1x256xf32>
    %39 = vector.broadcast %38 : vector<1x256xf32> to vector<2x256xf32>
    %40 = arith.mulf %37, %39 : vector<2x256xf32>
    %cst_31 = arith.constant dense<0.000000e+00> : vector<2xf32>
    %41 = vector.multi_reduction <add>, %40, %cst_31 [1] : vector<2x256xf32> to vector<2xf32>
    %42 = vector.shape_cast %41 : vector<2xf32> to vector<2x1xf32>
    %c0_32 = arith.constant 0 : index
    %c0_33 = arith.constant 0 : index
    %43 = vector.load %arg13[%c0_32, %c0_33] : memref<1x1xf32, #tpu.memory_space<vmem>>, vector<1x1xf32>
    %44 = vector.broadcast %43 : vector<1x1xf32> to vector<2x1xf32>
    %45 = arith.addf %42, %44 : vector<2x1xf32>
    %c0_34 = arith.constant 0 : index
    %c0_35 = arith.constant 0 : index
    %46 = vector.load %arg14[%c0_34, %c0_35] : memref<2x1xf32, #tpu.memory_space<vmem>>, vector<2x1xf32>
    tpu.vector_store %arg14[%c0_34, %c0_35], %45 {strides = array<i32>} : memref<2x1xf32, #tpu.memory_space<vmem>>, vector<2x1xf32>,
    return
  }
  func.func @transform_0(%arg0: i32) -> (i32, i32) {
    %c0_i32 = arith.constant 0 : i32
    %c0_i32_0 = arith.constant 0 : i32
    return %arg0, %c0_i32 : i32, i32
  }
  func.func @transform_1(%arg0: i32) -> (i32, i32) {
    %c0_i32 = arith.constant 0 : i32
    %c0_i32_0 = arith.constant 0 : i32
    return %arg0, %c0_i32 : i32, i32
  }
  func.func @transform_2(%arg0: i32) -> (i32, i32) {
    %c0_i32 = arith.constant 0 : i32
    %c0_i32_0 = arith.constant 0 : i32
    %c0_i32_1 = arith.constant 0 : i32
    return %c0_i32, %c0_i32_0 : i32, i32
  }
  func.func @transform_3(%arg0: i32) -> (i32, i32) {
    %c0_i32 = arith.constant 0 : i32
    %c0_i32_0 = arith.constant 0 : i32
    %c0_i32_1 = arith.constant 0 : i32
    return %c0_i32, %c0_i32_0 : i32, i32
  }
  func.func @transform_4(%arg0: i32) -> (i32, i32) {
    %c0_i32 = arith.constant 0 : i32
    %c0_i32_0 = arith.constant 0 : i32
    %c0_i32_1 = arith.constant 0 : i32
    return %c0_i32, %c0_i32_0 : i32, i32
  }
  func.func @transform_5(%arg0: i32) -> (i32, i32) {
    %c0_i32 = arith.constant 0 : i32
    %c0_i32_0 = arith.constant 0 : i32
    %c0_i32_1 = arith.constant 0 : i32
    return %c0_i32, %c0_i32_0 : i32, i32
  }
  func.func @transform_6(%arg0: i32) -> (i32, i32) {
    %c0_i32 = arith.constant 0 : i32
    %c0_i32_0 = arith.constant 0 : i32
    %c0_i32_1 = arith.constant 0 : i32
    return %c0_i32, %c0_i32_0 : i32, i32
  }
  func.func @transform_7(%arg0: i32) -> (i32, i32) {
    %c0_i32 = arith.constant 0 : i32
    %c0_i32_0 = arith.constant 0 : i32
    %c0_i32_1 = arith.constant 0 : i32
    return %c0_i32, %c0_i32_0 : i32, i32
  }
  func.func @transform_8(%arg0: i32) -> (i32, i32) {
    %c0_i32 = arith.constant 0 : i32
    %c0_i32_0 = arith.constant 0 : i32
    %c0_i32_1 = arith.constant 0 : i32
    return %c0_i32, %c0_i32_0 : i32, i32
  }
  func.func @transform_9(%arg0: i32) -> (i32, i32) {
    %c0_i32 = arith.constant 0 : i32
    %c0_i32_0 = arith.constant 0 : i32
    %c0_i32_1 = arith.constant 0 : i32
    return %c0_i32, %c0_i32_0 : i32, i32
  }
  func.func @transform_10(%arg0: i32) -> (i32, i32) {
    %c0_i32 = arith.constant 0 : i32
    %c0_i32_0 = arith.constant 0 : i32
    %c0_i32_1 = arith.constant 0 : i32
    return %c0_i32, %c0_i32_0 : i32, i32
  }
  func.func @transform_11(%arg0: i32) -> (i32, i32) {
    %c0_i32 = arith.constant 0 : i32
    %c0_i32_0 = arith.constant 0 : i32
    %c0_i32_1 = arith.constant 0 : i32
    return %c0_i32, %c0_i32_0 : i32, i32
  }
  func.func @transform_12(%arg0: i32) -> (i32, i32) {
    %c0_i32 = arith.constant 0 : i32
    %c0_i32_0 = arith.constant 0 : i32
    %c0_i32_1 = arith.constant 0 : i32
    return %c0_i32, %c0_i32_0 : i32, i32
  }
  func.func @transform_13(%arg0: i32) -> (i32, i32) {
    %c0_i32 = arith.constant 0 : i32
    %c0_i32_0 = arith.constant 0 : i32
    return %arg0, %c0_i32 : i32, i32
  }
}

</mosaic_0001>

<bundles_post_ra>
// kernel: tpu_custom_call.1
= control target key start
LH: loop header
LB: loop body
LE: loop exit
PB: predicated region body
PF: predicated region fallthrough
CT: control target
= control target key end

     0   :  { %s1603_s0 = inlined_call_operand.vmem [shape: f32[2,24], index: 0, kind: input, shape index: {}]   ;;  %s1604_s1 = inlined_call_operand.hbm [shape: f32[2,8], index: 1, kind: input, shape index: {}]   ;;  %s1605_s2 = inlined_call_operand.hbm [shape: bf16[24,256], index: 2, kind: input, shape index: {}]   ;;  %s1606_s3 = inlined_call_operand.hbm [shape: bf16[8,256], index: 3, kind: input, shape index: {}]   ;;  %s1607_s4 = inlined_call_operand.vmem [shape: f32[1,256], index: 4, kind: input, shape index: {}]   ;;  %s1608_s5 = inlined_call_operand.hbm [shape: bf16[256,256], index: 5, kind: input, shape index: {}]   ;;  %s1609_s6 = inlined_call_operand.vmem [shape: f32[1,256], index: 6, kind: input, shape index: {}]   ;;  %s1610_s7 = inlined_call_operand.hbm [shape: bf16[256,256], index: 7, kind: input, shape index: {}]   ;;  %s1611_s8 = inlined_call_operand.vmem [shape: f32[1,256], index: 8, kind: input, shape index: {}]   ;;  %s1612_s9 = inlined_call_operand.hbm [shape: bf16[256,256], index: 9, kind: input, shape index: {}]   ;;  %s1613_s10 = inlined_call_operand.vmem [shape: f32[1,256], index: 10, kind: input, shape index: {}]   ;;  %s1614_s11 = inlined_call_operand.vmem [shape: f32[1,256], index: 11, kind: input, shape index: {}]   ;;  %s1615_s12 = inlined_call_operand.<no memory space> [shape: f32[1,1], index: 12, kind: input, shape index: {}]   ;;  %s1616_s13 = inlined_call_operand.vmem [shape: f32[2,1], index: 13, kind: output, shape index: {}]  }
   0x1   :  { %v18_v0 = vstv %s1615_s12 }
   0x2   :  { %19 = vst [vmem:[#allocation2] sm:$0x1] %v18_v0 }
   0x3   :  { %20 = vsyncpa [#allocation4], 0 }
   0x4   :  { %21 = vsyncpa [#allocation6], 0 }
   0x5   :  { %22 = vsyncpa [#allocation9], 0 }
   0x6   :  { %23 = vsyncpa [#allocation12], 0  ;;  %s1452_s27 = smov [#allocation5]  }
   0x7   :  { %s41_s28 = sshll.u32 %s1452_s27, 4  ;;  %s42_s28 = int_to_ptr.vmem [resolvable:$true] %s41_s28 }
   0x8   :  { %s1332_s29 = scalar_lea.vmem %s42_s28, 384  ;;  %p1337_p1 = scmp.lt.s32.totalorder %s42_s28, %s42_s28 }
   0x9   :  { %p1333_p0 = scmp.ne.s32.totalorder %s42_s28, %s1332_s29  ;;  %p1338_p2 = scmp.lt.s32.totalorder %s1332_s29, %s1332_s29 }
   0xb   :  { %p1339_p3 = por %p1338_p2, %p1337_p1 }
   0xd   :  { %p1340_p4 = pnand %p1339_p3, %p1333_p0 }
   0xf   :  { %1343 = shalt.err (!%p1340_p4)
}
  0x10   :  { %s1453_s30 = smov 128   ;;  %s1454_s14 = smov 8  }
  0x11   :  { %47 = dma.hbm_to_vmem [thread:$0]  %s1605_s2, 384, %s42_s28, [#allocation6], %s1453_s30, %s1453_s30, %s1454_s14  }
  0x12   :  { %s1455_s16 = smov [#allocation8]   ;;  %s1456_s18 = smov [#allocation3]  }
  0x13   :  { %s65_s17 = sshll.u32 %s1455_s16, 4  ;;  %s32_s19 = sshll.u32 %s1456_s18, 4  ;;  %s66_s17 = int_to_ptr.vmem [resolvable:$true] %s65_s17  ;;  %s33_s19 = int_to_ptr.vmem [resolvable:$true] %s32_s19 }
  0x14   :  { %s1352_s20 = scalar_lea.vmem %s66_s17, 4096  ;;  %p1357_p6 = scmp.lt.s32.totalorder %s66_s17, %s66_s17 }
  0x15   :  { %p1353_p5 = scmp.ne.s32.totalorder %s66_s17, %s1352_s20  ;;  %p1358_p7 = scmp.lt.s32.totalorder %s1352_s20, %s1352_s20 }
  0x17   :  { %p1359_p8 = por %p1358_p7, %p1357_p6 }
  0x19   :  { %p1360_p9 = pnand %p1359_p8, %p1353_p5 }
  0x1b   :  { %1363 = shalt.err (!%p1360_p9)
}
  0x1c   :  { %71 = dma.hbm_to_vmem [thread:$0]  %s1608_s5, 4096, %s66_s17, [#allocation9], %s1453_s30, %s1453_s30, %s1454_s14  }
  0x1d   :  { %s1372_s2 = scalar_lea.vmem %s33_s19, 32  ;;  %p1377_p11 = scmp.lt.s32.totalorder %s33_s19, %s33_s19 }
  0x1e   :  { %p1373_p10 = scmp.ne.s32.totalorder %s33_s19, %s1372_s2  ;;  %p1378_p12 = scmp.lt.s32.totalorder %s1372_s2, %s1372_s2 }
  0x20   :  { %p1379_p13 = por %p1378_p12, %p1377_p11 }
  0x22   :  { %p1380_p0 = pnand %p1379_p13, %p1373_p10 }
  0x24   :  { %1383 = shalt.err (!%p1380_p0)
}
  0x25   :  { %35 = dma.hbm_to_vmem [thread:$0]  %s1604_s1, 32, %s33_s19, [#allocation4]  }
  0x26   :  { %s1457_s25 = smov [#allocation7]   ;;  %s1458_s27 = smov [#allocation10]  }
  0x27   :  { %s54_s26 = sshll.u32 %s1457_s25, 4  ;;  %s79_s28 = sshll.u32 %s1458_s27, 4  ;;  %s55_s26 = int_to_ptr.vmem [resolvable:$true] %s54_s26  ;;  %s80_s28 = int_to_ptr.vmem [resolvable:$true] %s79_s28 }
  0x28   :  { %s1392_s29 = scalar_lea.vmem %s55_s26, 128  ;;  %p1397_p2 = scmp.lt.s32.totalorder %s55_s26, %s55_s26 }
  0x29   :  { %p1393_p1 = scmp.ne.s32.totalorder %s55_s26, %s1392_s29  ;;  %p1398_p3 = scmp.lt.s32.totalorder %s1392_s29, %s1392_s29 }
  0x2b   :  { %p1399_p4 = por %p1398_p3, %p1397_p2 }
  0x2d   :  { %p1400_p5 = pnand %p1399_p4, %p1393_p1 }
  0x2f   :  { %1403 = shalt.err (!%p1400_p5)
}
  0x30   :  { %57 = dma.hbm_to_vmem [thread:$0]  %s1606_s3, 128, %s55_s26, [#allocation6]  }
  0x31   :  { %s1412_s15 = scalar_lea.vmem %s80_s28, 4096  ;;  %p1417_p7 = scmp.lt.s32.totalorder %s80_s28, %s80_s28 }
  0x32   :  { %p1413_p6 = scmp.ne.s32.totalorder %s80_s28, %s1412_s15  ;;  %p1418_p8 = scmp.lt.s32.totalorder %s1412_s15, %s1412_s15 }
  0x34   :  { %p1419_p9 = por %p1418_p8, %p1417_p7 }
  0x36   :  { %p1420_p10 = pnand %p1419_p9, %p1413_p6 }
  0x38   :  { %1423 = shalt.err (!%p1420_p10)
}
  0x39   :  { %85 = dma.hbm_to_vmem [thread:$0]  %s1610_s7, 4096, %s80_s28, [#allocation9], %s1453_s30, %s1453_s30, %s1454_s14  }
  0x3a   :  { %s1459_s17 = smov [#allocation11]  }
  0x3b   :  { %s93_s18 = sshll.u32 %s1459_s17, 4  ;;  %s94_s18 = int_to_ptr.vmem [resolvable:$true] %s93_s18 }
  0x3c   :  { %s1432_s19 = scalar_lea.vmem %s94_s18, 4096  ;;  %p1437_p12 = scmp.lt.s32.totalorder %s94_s18, %s94_s18 }
  0x3d   :  { %p1433_p11 = scmp.ne.s32.totalorder %s94_s18, %s1432_s19  ;;  %p1438_p13 = scmp.lt.s32.totalorder %s1432_s19, %s1432_s19 }
  0x3f   :  { %p1439_p0 = por %p1438_p13, %p1437_p12 }
  0x41   :  { %p1440_p1 = pnand %p1439_p0, %p1433_p11 }
  0x43   :  { %1443 = shalt.err (!%p1440_p1)
}
  0x44   :  { %99 = dma.hbm_to_vmem [thread:$0]  %s1612_s9, 4096, %s94_s18, [#allocation12], %s1453_s30, %s1453_s30, %s1454_s14  }
  0x45   :  { %1444 = dma.done.wait [#allocation4], 32  }
  0x46   :  { %1445 = vsyncadd [#allocation4], 4294967264 }
  0x47   :  { %1446 = dma.done.wait [#allocation6], 512  }
  0x48   :  { %1447 = vsyncadd [#allocation6], 4294966784 }
  0x49   :  { %1448 = dma.done.wait [#allocation9], 8192  }
  0x4a   :  { %1449 = vsyncadd [#allocation9], 4294959104 }
  0x4b   :  { %1450 = dma.done.wait [#allocation12], 4096  }
  0x4c   :  { %1451 = vsyncadd [#allocation12], 4294963200  ;;  %v1460_v1 = vmov 0   ;;  %v132_v2 = vld [vmem:[#allocation7] sm:$0xff]  ;;  %vm142_vm0 = vcmask 1043456   ;;  %v131_v4 = vld [vmem:[#allocation5 + $0x10] sm:$0xff] }
  0x4d   :  { %181 = vmatprep.mubr.bf16.mxu1 %v1460_v1  ;;  %v127_v3 = vld [vmem:[#allocation3] sm:$0x3]  ;;  %v1058_v5 = vcombine.high %v132_v2, %v132_v2  ;;  %v1057_v6 = vcombine.low %v132_v2, %v132_v2  ;;  %v1064_v7 = vcombine.high %v131_v4, %v131_v4  ;;  %v1063_v8 = vcombine.low %v131_v4, %v131_v4  ;;  %v1182_v12 = vld [vmem:[#allocation8 + $0x70] ss:$8 sps:$4 sm:$0xff]   ;;  %v1183_v13 = vld [vmem:[#allocation8 + $0x64] ss:$8 sps:$4 sm:$0xff]  }
  0x4e   :  { %v128_v10 = vpack.c.bf16 %v127_v3, %v127_v3  ;;  %v1180_v11 = vld [vmem:[#allocation8 + $0x74] ss:$8 sps:$4 sm:$0xff]   ;;  %vm138_vm1 = vcmask 64512   ;;  %v1179_v15 = vld [vmem:[#allocation5 + $0x4] ss:$8 sps:$4 sm:$0xff]   ;;  %vm205_vm2 = vcmask 195584  }
  0x4f   :  { %1059 = vmatprep.subr.msk.bf16.mxu1 %vm142_vm0, %v1058_v5  ;;  %v144_v9 = vsel %vm142_vm0, %v1057_v6, 0  ;;  %v210_v14 = vsel %vm142_vm0, %v1063_v8, 0  ;;  %478 = vmatprep.subr.bf16.mxu0 %v1180_v11  ;;  %v1185_v16 = vld [vmem:[#allocation8 + $0x60] ss:$8 sps:$4 sm:$0xff]   ;;  %v1186_v18 = vld [vmem:[#allocation8 + $0x54] ss:$8 sps:$4 sm:$0xff]  }
  0x50   :  { %164 = vmatpush1.bf16.msra.mxu1 %v144_v9  ;;  %479 = vmatpush1.bf16.msra.mxu0 %v1182_v12  ;;  %v1177_v17 = vld [vmem:[#allocation5] ss:$8 sps:$4 sm:$0xff]   ;;  %v125_v19 = vld [vmem:[%s1603_s0] sm:$0x3]  ;;  %v1188_v20 = vld [vmem:[#allocation8 + $0x50] ss:$8 sps:$4 sm:$0xff]   ;;  %v258_v12 = vlaneseq }
  0x51   :  { %1065 = vmatprep.subr.msk.bf16.mxu1 %vm142_vm0, %v1064_v7  ;;  %480 = vmatprep.subr.bf16.mxu0 %v1183_v13  ;;  %v126_v21 = vpack.c.bf16 %v125_v19, %v125_v19  ;;  %v1189_v22 = vld [vmem:[#allocation8 + $0x44] ss:$8 sps:$4 sm:$0xff]   ;;  %v1191_v23 = vld [vmem:[#allocation8 + $0x40] ss:$8 sps:$4 sm:$0xff]   ;;  %v1192_v24 = vld [vmem:[#allocation8 + $0x34] ss:$8 sps:$4 sm:$0xff]  }
  0x52   :  { %v1194_v25 = vld [vmem:[#allocation8 + $0x30] ss:$8 sps:$4 sm:$0xff]   ;;  %v1195_v26 = vld [vmem:[#allocation8 + $0x24] ss:$8 sps:$4 sm:$0xff]   ;;  %v1197_v27 = vld [vmem:[#allocation8 + $0x20] ss:$8 sps:$4 sm:$0xff]  }
  0x53   :  { %1060 = vmatmul.mubr.msk.bf16.vlgmr.msra.gmra.mxu1 %vm138_vm1, %v128_v10  ;;  %v1198_v28 = vld [vmem:[#allocation8 + $0x14] ss:$8 sps:$4 sm:$0xff]   ;;  %v1200_v29 = vld [vmem:[#allocation8 + $0x10] ss:$8 sps:$4 sm:$0xff]   ;;  %v1201_v30 = vld [vmem:[#allocation8 + $0x4] ss:$8 sps:$4 sm:$0xff]  }
  0x54   :  { %228 = vmatpush1.bf16.msra.mxu1 %v210_v14  ;;  %247 = vmatprep.mubr.bf16.mxu1 %v1460_v1  ;;  %v1203_v31 = vld [vmem:[#allocation8] ss:$8 sps:$4 sm:$0xff]   ;;  %v1204_v32 = vld [vmem:[#allocation8 + $0xf4] ss:$8 sps:$4 sm:$0xff]   ;;  %v1206_v33 = vld [vmem:[#allocation8 + $0xf0] ss:$8 sps:$4 sm:$0xff]  }
  0x55   :  { %229 = vmatprep.subr.bf16.mxu1 %v1179_v15  ;;  %481 = vmatpush1.bf16.msra.mxu0 %v1185_v16  ;;  %v1207_v34 = vld [vmem:[#allocation8 + $0xe4] ss:$8 sps:$4 sm:$0xff]   ;;  %v1209_v35 = vld [vmem:[#allocation8 + $0xe0] ss:$8 sps:$4 sm:$0xff]   ;;  %v1210_v36 = vld [vmem:[#allocation8 + $0xd4] ss:$8 sps:$4 sm:$0xff]  }
  0x56   :  { %482 = vmatprep.subr.bf16.mxu0 %v1186_v18  ;;  %v1212_v37 = vld [vmem:[#allocation8 + $0xd0] ss:$8 sps:$4 sm:$0xff]   ;;  %v1213_v38 = vld [vmem:[#allocation8 + $0xc4] ss:$8 sps:$4 sm:$0xff]   ;;  %v1215_v39 = vld [vmem:[#allocation8 + $0xc0] ss:$8 sps:$4 sm:$0xff]  }
  0x57   :  { %v1216_v40 = vld [vmem:[#allocation8 + $0xb4] ss:$8 sps:$4 sm:$0xff]   ;;  %v1218_v41 = vld [vmem:[#allocation8 + $0xb0] ss:$8 sps:$4 sm:$0xff]   ;;  %v1219_v42 = vld [vmem:[#allocation8 + $0xa4] ss:$8 sps:$4 sm:$0xff]  }
  0x58   :  { %230 = vmatpush1.bf16.msra.mxu1 %v1177_v17  ;;  %v1221_v43 = vld [vmem:[#allocation8 + $0xa0] ss:$8 sps:$4 sm:$0xff]   ;;  %v1222_v44 = vld [vmem:[#allocation8 + $0x94] ss:$8 sps:$4 sm:$0xff]   ;;  %v1224_v45 = vld [vmem:[#allocation8 + $0x90] ss:$8 sps:$4 sm:$0xff]  }
  0x59   :  { %483 = vmatpush1.bf16.msra.mxu0 %v1188_v20  ;;  %v1225_v46 = vld [vmem:[#allocation8 + $0x84] ss:$8 sps:$4 sm:$0xff]   ;;  %v1227_v47 = vld [vmem:[#allocation8 + $0x80] ss:$8 sps:$4 sm:$0xff]   ;;  %v1228_v48 = vld [vmem:[#allocation10 + $0x70] ss:$8 sps:$4 sm:$0xff]  }
  0x5a   :  { %484 = vmatprep.subr.bf16.mxu0 %v1189_v22  ;;  %v1230_v49 = vld [vmem:[#allocation10 + $0x74] ss:$8 sps:$4 sm:$0xff]   ;;  %v1233_v50 = vld [vmem:[#allocation10 + $0x64] ss:$8 sps:$4 sm:$0xff]   ;;  %v1231_v51 = vld [vmem:[#allocation10 + $0x60] ss:$8 sps:$4 sm:$0xff]  }
  0x5b   :  { %1066 = vmatmul.mubr.msk.bf16.vlgmr.msra.gmra.mxu1 %vm205_vm2, %v126_v21  ;;  %727 = vmatprep.subr.bf16.mxu1 %v1230_v49  ;;  %v1236_v52 = vld [vmem:[#allocation10 + $0x54] ss:$8 sps:$4 sm:$0xff]   ;;  %v1234_v53 = vld [vmem:[#allocation10 + $0x50] ss:$8 sps:$4 sm:$0xff]   ;;  %v1239_v54 = vld [vmem:[#allocation10 + $0x44] ss:$8 sps:$4 sm:$0xff]  }
  0x5c   :  { %728 = vmatpush1.bf16.msra.mxu1 %v1228_v48  ;;  %v1237_v55 = vld [vmem:[#allocation10 + $0x40] ss:$8 sps:$4 sm:$0xff]   ;;  %v1242_v56 = vld [vmem:[#allocation10 + $0x34] ss:$8 sps:$4 sm:$0xff]   ;;  %v1240_v57 = vld [vmem:[#allocation10 + $0x30] ss:$8 sps:$4 sm:$0xff]  }
  0x5d   :  { %485 = vmatpush1.bf16.msra.mxu0 %v1191_v23  ;;  %729 = vmatprep.subr.bf16.mxu1 %v1233_v50  ;;  %v1245_v58 = vld [vmem:[#allocation10 + $0x24] ss:$8 sps:$4 sm:$0xff]   ;;  %v1243_v59 = vld [vmem:[#allocation10 + $0x20] ss:$8 sps:$4 sm:$0xff]   ;;  %v1248_v60 = vld [vmem:[#allocation10 + $0x14] ss:$8 sps:$4 sm:$0xff]  }
  0x5e   :  { %486 = vmatprep.subr.bf16.mxu0 %v1192_v24  ;;  %v1246_v61 = vld [vmem:[#allocation10 + $0x10] ss:$8 sps:$4 sm:$0xff]   ;;  %v1251_v62 = vld [vmem:[#allocation10 + $0x4] ss:$8 sps:$4 sm:$0xff]   ;;  %v1249_v63 = vld [vmem:[#allocation10] ss:$8 sps:$4 sm:$0xff]  }
  0x5f   :  { %v1254_v0 = vld [vmem:[#allocation10 + $0xf4] ss:$8 sps:$4 sm:$0xff]   ;;  %v1252_v1 = vld [vmem:[#allocation10 + $0xf0] ss:$8 sps:$4 sm:$0xff]   ;;  %v1257_v2 = vld [vmem:[#allocation10 + $0xe4] ss:$8 sps:$4 sm:$0xff]  }
  0x60   :  { %730 = vmatpush1.bf16.msra.mxu1 %v1231_v51  ;;  %v1255_v3 = vld [vmem:[#allocation10 + $0xe0] ss:$8 sps:$4 sm:$0xff]   ;;  %v1260_v4 = vld [vmem:[#allocation10 + $0xd4] ss:$8 sps:$4 sm:$0xff]   ;;  %v1258_v5 = vld [vmem:[#allocation10 + $0xd0] ss:$8 sps:$4 sm:$0xff]  }
  0x61   :  { %487 = vmatpush1.bf16.msra.mxu0 %v1194_v25  ;;  %731 = vmatprep.subr.bf16.mxu1 %v1236_v52  ;;  %v1263_v6 = vld [vmem:[#allocation10 + $0xc4] ss:$8 sps:$4 sm:$0xff]   ;;  %v1261_v7 = vld [vmem:[#allocation10 + $0xc0] ss:$8 sps:$4 sm:$0xff]   ;;  %v1266_v8 = vld [vmem:[#allocation10 + $0xb4] ss:$8 sps:$4 sm:$0xff]  }
  0x62   :  { %488 = vmatprep.subr.bf16.mxu0 %v1195_v26  ;;  %v1264_v9 = vld [vmem:[#allocation10 + $0xb0] ss:$8 sps:$4 sm:$0xff]   ;;  %v1269_v10 = vld [vmem:[#allocation10 + $0xa4] ss:$8 sps:$4 sm:$0xff]   ;;  %v1267_v11 = vld [vmem:[#allocation10 + $0xa0] ss:$8 sps:$4 sm:$0xff]  }
  0x63   :  { %v259_v13 = vshrl.u32 %v258_v12, 7  ;;  %v256_v18 = vld [vmem:[%s1607_s4] sm:$0x3]  ;;  %v1288_v48 = vld [vmem:[#allocation11 + $0x30] ss:$8 sps:$4 sm:$0xff]   ;;  %vm1033_vm3 = vcmask 1041408  }
  0x64   :  { %732 = vmatpush1.bf16.msra.mxu1 %v1234_v53  ;;  %v1293_v49 = vld [vmem:[#allocation11 + $0x24] ss:$8 sps:$4 sm:$0xff]   ;;  %v1291_v50 = vld [vmem:[#allocation11 + $0x20] ss:$8 sps:$4 sm:$0xff]   ;;  %v1296_v51 = vld [vmem:[#allocation11 + $0x14] ss:$8 sps:$4 sm:$0xff]  }
  0x65   :  { %489 = vmatpush1.bf16.msra.mxu0 %v1197_v27  ;;  %733 = vmatprep.subr.bf16.mxu1 %v1239_v54  ;;  %v1571_v16 = vsub.s32 0, %v259_v13  ;;  %v1576_v19 = vsub.s32 1, %v259_v13  ;;  %v1294_v52 = vld [vmem:[#allocation11 + $0x10] ss:$8 sps:$4 sm:$0xff]   ;;  %v1299_v53 = vld [vmem:[#allocation11 + $0x4] ss:$8 sps:$4 sm:$0xff]  }
  0x66   :  { %490 = vmatprep.subr.bf16.mxu0 %v1198_v28  ;;  %v1297_v54 = vld [vmem:[#allocation11] ss:$8 sps:$4 sm:$0xff]   ;;  %vm1047_vm4 = vcmask 1024  }
  0x67   :  { %v261_v21 = vrot.slane %v256_v18, %v1571_v16  ;;  %v265_v24 = vrot.slane %v256_v18, %v1576_v19  ;;  %v1318_v18 = vld [vmem:[#allocation11 + $0x90] ss:$8 sps:$4 sm:$0xff]  }
  0x68   :  { %734 = vmatpush1.bf16.msra.mxu1 %v1237_v55  ;;  %v1302_v55 = vld [vmem:[#allocation11 + $0xf4] ss:$8 sps:$4 sm:$0xff]  }
  0x69   :  { %491 = vmatpush1.bf16.msra.mxu0 %v1200_v29  ;;  %735 = vmatprep.subr.bf16.mxu1 %v1242_v56  ;;  %v1300_v56 = vld [vmem:[#allocation11 + $0xf0] ss:$8 sps:$4 sm:$0xff]  }
  0x6a   :  { %492 = vmatprep.subr.bf16.mxu0 %v1201_v30 }
  0x6c   :  { %736 = vmatpush1.bf16.msra.mxu1 %v1240_v57  ;;  %v1305_v57 = vld [vmem:[#allocation11 + $0xe4] ss:$8 sps:$4 sm:$0xff]  }
  0x6d   :  { %493 = vmatpush1.bf16.msra.mxu0 %v1203_v31  ;;  %737 = vmatprep.subr.bf16.mxu1 %v1245_v58  ;;  %v1303_v58 = vld [vmem:[#allocation11 + $0xe0] ss:$8 sps:$4 sm:$0xff]  }
  0x6e   :  { %494 = vmatprep.subr.bf16.mxu0 %v1204_v32 }
  0x70   :  { %738 = vmatpush1.bf16.msra.mxu1 %v1243_v59  ;;  %v1308_v59 = vld [vmem:[#allocation11 + $0xd4] ss:$8 sps:$4 sm:$0xff]  }
  0x71   :  { %495 = vmatpush2.bf16.msra.mxu0 %v1206_v33  ;;  %739 = vmatprep.subr.bf16.mxu1 %v1248_v60  ;;  %v1306_v60 = vld [vmem:[#allocation11 + $0xd0] ss:$8 sps:$4 sm:$0xff]  }
  0x72   :  { %496 = vmatprep.subr.bf16.mxu0 %v1207_v34 }
  0x74   :  { %740 = vmatpush1.bf16.msra.mxu1 %v1246_v61  ;;  %v1311_v61 = vld [vmem:[#allocation11 + $0xc4] ss:$8 sps:$4 sm:$0xff]  }
  0x75   :  { %497 = vmatpush2.bf16.msra.mxu0 %v1209_v35  ;;  %741 = vmatprep.subr.bf16.mxu1 %v1251_v62  ;;  %v1272_v35 = vld [vmem:[#allocation10 + $0x94] ss:$8 sps:$4 sm:$0xff]   ;;  %v1309_v62 = vld [vmem:[#allocation11 + $0xc0] ss:$8 sps:$4 sm:$0xff]  }
  0x76   :  { %498 = vmatprep.subr.bf16.mxu0 %v1210_v36  ;;  %v1270_v36 = vld [vmem:[#allocation10 + $0x90] ss:$8 sps:$4 sm:$0xff]  }
  0x78   :  { %742 = vmatpush1.bf16.msra.mxu1 %v1249_v63  ;;  %v1314_v63 = vld [vmem:[#allocation11 + $0xb4] ss:$8 sps:$4 sm:$0xff]  }
  0x79   :  { %499 = vmatpush2.bf16.msra.mxu0 %v1212_v37  ;;  %743 = vmatprep.subr.bf16.mxu1 %v1254_v0  ;;  %v1275_v37 = vld [vmem:[#allocation10 + $0x84] ss:$8 sps:$4 sm:$0xff]   ;;  %v1312_v0 = vld [vmem:[#allocation11 + $0xb0] ss:$8 sps:$4 sm:$0xff]  }
  0x7a   :  { %500 = vmatprep.subr.bf16.mxu0 %v1213_v38  ;;  %v1273_v38 = vld [vmem:[#allocation10 + $0x80] ss:$8 sps:$4 sm:$0xff]  }
  0x7c   :  { %744 = vmatpush2.bf16.msra.mxu1 %v1252_v1  ;;  %v1317_v1 = vld [vmem:[#allocation11 + $0xa4] ss:$8 sps:$4 sm:$0xff]  }
  0x7d   :  { %501 = vmatpush2.bf16.msra.mxu0 %v1215_v39  ;;  %745 = vmatprep.subr.bf16.mxu1 %v1257_v2  ;;  %v1276_v39 = vld [vmem:[#allocation11 + $0x70] ss:$8 sps:$4 sm:$0xff]   ;;  %v1315_v2 = vld [vmem:[#allocation11 + $0xa0] ss:$8 sps:$4 sm:$0xff]  }
  0x7e   :  { %502 = vmatprep.subr.bf16.mxu0 %v1216_v40  ;;  %v1278_v40 = vld [vmem:[#allocation11 + $0x74] ss:$8 sps:$4 sm:$0xff]  }
  0x80   :  { %746 = vmatpush2.bf16.msra.mxu1 %v1255_v3  ;;  %v306_v3 = vld [vmem:[%s1609_s6] sm:$0x3] }
  0x81   :  { %503 = vmatpush2.bf16.msra.mxu0 %v1218_v41  ;;  %747 = vmatprep.subr.bf16.mxu1 %v1260_v4  ;;  %v1281_v41 = vld [vmem:[#allocation11 + $0x64] ss:$8 sps:$4 sm:$0xff]   ;;  %v311_v4 = vrot.slane %v306_v3, %v1571_v16 }
  0x82   :  { %504 = vmatprep.subr.bf16.mxu0 %v1219_v42  ;;  %v1279_v42 = vld [vmem:[#allocation11 + $0x60] ss:$8 sps:$4 sm:$0xff]  }
  0x84   :  { %748 = vmatpush2.bf16.msra.mxu1 %v1258_v5  ;;  %v315_v5 = vrot.slane %v306_v3, %v1576_v19 }
  0x85   :  { %505 = vmatpush2.bf16.msra.mxu0 %v1221_v43  ;;  %749 = vmatprep.subr.bf16.mxu1 %v1263_v6  ;;  %v1284_v43 = vld [vmem:[#allocation11 + $0x54] ss:$8 sps:$4 sm:$0xff]  }
  0x86   :  { %506 = vmatprep.subr.bf16.mxu0 %v1222_v44  ;;  %v1282_v44 = vld [vmem:[#allocation11 + $0x50] ss:$8 sps:$4 sm:$0xff]  }
  0x88   :  { %750 = vmatpush2.bf16.msra.mxu1 %v1261_v7 }
  0x89   :  { %507 = vmatpush2.bf16.msra.mxu0 %v1224_v45  ;;  %751 = vmatprep.subr.bf16.mxu1 %v1266_v8  ;;  %v1287_v45 = vld [vmem:[#allocation11 + $0x44] ss:$8 sps:$4 sm:$0xff]  }
  0x8a   :  { %508 = vmatprep.subr.bf16.mxu0 %v1225_v46  ;;  %v1285_v46 = vld [vmem:[#allocation11 + $0x40] ss:$8 sps:$4 sm:$0xff]  }
  0x8c   :  { %752 = vmatpush2.bf16.msra.mxu1 %v1264_v9 }
  0x8d   :  { %509 = vmatpush2.bf16.msra.mxu0 %v1227_v47  ;;  %753 = vmatprep.subr.bf16.mxu1 %v1269_v10  ;;  %v1290_v47 = vld [vmem:[#allocation11 + $0x34] ss:$8 sps:$4 sm:$0xff]  }
  0x8e   :  { %976 = vmatprep.subr.bf16.mxu0 %v1278_v40 }
  0x90   :  { %754 = vmatpush2.bf16.msra.mxu1 %v1267_v11 }
  0x91   :  { %755 = vmatprep.subr.bf16.mxu1 %v1272_v35  ;;  %v804_v35 = vld [vmem:[%s1613_s10] sm:$0x3] }
  0x94   :  { %756 = vmatpush2.bf16.msra.mxu1 %v1270_v36  ;;  %v809_v36 = vrot.slane %v804_v35, %v1571_v16 }
  0x95   :  { %757 = vmatprep.subr.bf16.mxu1 %v1275_v37  ;;  %v1019_v37 = vld [vmem:[%s1614_s11] sm:$0x3] }
  0x98   :  { %758 = vmatpush2.bf16.msra.mxu1 %v1273_v38  ;;  %v813_v38 = vrot.slane %v804_v35, %v1576_v19 }
 0x113   :  { %v183_v14 = vpop.f32.mrf.mxu1 }
 0x115   :  { %v185_v15 = vpop.f32.mrf.mxu1 }
 0x117   :  { %v187_v17 = vpop.f32.mrf.mxu1 }
 0x118   :  { %v1320_v17 = vld [vmem:[#allocation11 + $0x94] ss:$8 sps:$4 sm:$0xff]  }
 0x119   :  { %v188_v20 = vpop.f32.mrf.mxu1 }
 0x11a   :  { %v1323_v20 = vld [vmem:[#allocation11 + $0x84] ss:$8 sps:$4 sm:$0xff]  }
 0x11b   :  { %v249_v22 = vpop.f32.mrf.mxu1 }
 0x11c   :  { %v250_v23 = vadd.f32 %v249_v22, %v183_v14  ;;  %v555_v22 = vld [vmem:[%s1611_s8] sm:$0x3] }
 0x11d   :  { %v251_v25 = vpop.f32.mrf.mxu1 }
 0x11e   :  { %v268_v26 = vadd.f32 %v261_v21, %v250_v23  ;;  %v252_v27 = vadd.f32 %v251_v25, %v185_v15  ;;  %v1321_v21 = vld [vmem:[#allocation11 + $0x80] ss:$8 sps:$4 sm:$0xff]   ;;  %v560_v23 = vrot.slane %v555_v22, %v1571_v16 }
 0x11f   :  { %v253_v28 = vpop.f32.mrf.mxu1 }
 0x120   :  { %v269_v29 = vadd.f32 %v265_v24, %v252_v27  ;;  %v270_v30 = vmax.f32 %v268_v26, 0.0  ;;  %v564_v24 = vrot.slane %v555_v22, %v1576_v19 }
 0x121   :  { %v254_v31 = vpop.f32.mrf.mxu1 }
 0x122   :  { %v271_v32 = vmax.f32 %v269_v29, 0.0  ;;  %v272_v34 = vpack.c.bf16 %v270_v30, %v270_v30 }
 0x124   :  { %v273_v33 = vpack.c.bf16 %v271_v32, %v271_v32 }
 0x126   :  { %510 = vmatprep.mubr.bf16.mxu0 %v273_v33 }
 0x127   :  { %511 = vmatmul.mubr.bf16.vlgmr.msra.gmra.mxu0 %v272_v34 }
 0x128   :  { %977 = vmatpush1.bf16.msra.mxu0 %v1276_v39 }
 0x129   :  { %978 = vmatprep.subr.bf16.mxu0 %v1281_v41  ;;  %v1024_v41 = vrot.slane %v1019_v37, %v1571_v16 }
 0x12c   :  { %979 = vmatpush1.bf16.msra.mxu0 %v1279_v42 }
 0x12d   :  { %980 = vmatprep.subr.bf16.mxu0 %v1284_v43 }
 0x130   :  { %981 = vmatpush1.bf16.msra.mxu0 %v1282_v44 }
 0x131   :  { %982 = vmatprep.subr.bf16.mxu0 %v1287_v45  ;;  %v1028_v45 = vrot.slane %v1019_v37, %v1576_v19 }
 0x134   :  { %983 = vmatpush1.bf16.msra.mxu0 %v1285_v46 }
 0x135   :  { %984 = vmatprep.subr.bf16.mxu0 %v1290_v47 }
 0x138   :  { %985 = vmatpush1.bf16.msra.mxu0 %v1288_v48 }
 0x139   :  { %986 = vmatprep.subr.bf16.mxu0 %v1293_v49 }
 0x13c   :  { %987 = vmatpush1.bf16.msra.mxu0 %v1291_v50 }
 0x13d   :  { %988 = vmatprep.subr.bf16.mxu0 %v1296_v51 }
 0x140   :  { %989 = vmatpush1.bf16.msra.mxu0 %v1294_v52 }
 0x141   :  { %990 = vmatprep.subr.bf16.mxu0 %v1299_v53 }
 0x144   :  { %991 = vmatpush1.bf16.msra.mxu0 %v1297_v54  ;;  %v1163_v54 = vld [vmem:[#allocation2] ss:$0 sm:$0xff] }
 0x145   :  { %992 = vmatprep.subr.bf16.mxu0 %v1302_v55 }
 0x148   :  { %993 = vmatpush2.bf16.msra.mxu0 %v1300_v56 }
 0x149   :  { %994 = vmatprep.subr.bf16.mxu0 %v1305_v57 }
 0x14c   :  { %995 = vmatpush2.bf16.msra.mxu0 %v1303_v58 }
 0x14d   :  { %996 = vmatprep.subr.bf16.mxu0 %v1308_v59 }
 0x150   :  { %997 = vmatpush2.bf16.msra.mxu0 %v1306_v60 }
 0x151   :  { %998 = vmatprep.subr.bf16.mxu0 %v1311_v61 }
 0x154   :  { %999 = vmatpush2.bf16.msra.mxu0 %v1309_v62 }
 0x155   :  { %1000 = vmatprep.subr.bf16.mxu0 %v1314_v63 }
 0x158   :  { %1001 = vmatpush2.bf16.msra.mxu0 %v1312_v0 }
 0x159   :  { %1002 = vmatprep.subr.bf16.mxu0 %v1317_v1 }
 0x15c   :  { %1003 = vmatpush2.bf16.msra.mxu0 %v1315_v2 }
 0x15d   :  { %1004 = vmatprep.subr.bf16.mxu0 %v1320_v17 }
 0x160   :  { %1005 = vmatpush2.bf16.msra.mxu0 %v1318_v18 }
 0x161   :  { %1006 = vmatprep.subr.bf16.mxu0 %v1323_v20 }
 0x164   :  { %1007 = vmatpush2.bf16.msra.mxu0 %v1321_v21 }
 0x1e7   :  { %v512_v6 = vpop.f32.mrf.mxu0 }
 0x1e8   :  { %v513_v7 = vadd.f32 %v512_v6, %v311_v4 }
 0x1e9   :  { %v514_v8 = vpop.f32.mrf.mxu0 }
 0x1ea   :  { %v515_v9 = vadd.f32 %v514_v8, %v315_v5  ;;  %v519_v10 = vmax.f32 %v513_v7, 0.0 }
 0x1eb   :  { %v516_v11 = vpop.f32.mrf.mxu0 }
 0x1ec   :  { %v520_v12 = vmax.f32 %v515_v9, 0.0  ;;  %v521_v15 = vpack.c.bf16 %v519_v10, %v519_v10 }
 0x1ed   :  { %v517_v13 = vpop.f32.mrf.mxu0 }
 0x1ee   :  { %v522_v14 = vpack.c.bf16 %v520_v12, %v520_v12 }
 0x1f0   :  { %759 = vmatprep.mubr.bf16.mxu1 %v522_v14 }
 0x1f1   :  { %760 = vmatmul.mubr.bf16.vlgmr.msra.gmra.mxu1 %v521_v15 }
 0x2b1   :  { %v761_v25 = vpop.f32.mrf.mxu1 }
 0x2b2   :  { %v762_v26 = vadd.f32 %v761_v25, %v560_v23 }
 0x2b3   :  { %v763_v27 = vpop.f32.mrf.mxu1 }
 0x2b4   :  { %v764_v28 = vadd.f32 %v763_v27, %v564_v24  ;;  %v768_v29 = vmax.f32 %v762_v26, 0.0 }
 0x2b5   :  { %v765_v30 = vpop.f32.mrf.mxu1 }
 0x2b6   :  { %v769_v31 = vmax.f32 %v764_v28, 0.0  ;;  %v770_v34 = vpack.c.bf16 %v768_v29, %v768_v29 }
 0x2b7   :  { %v766_v32 = vpop.f32.mrf.mxu1 }
 0x2b8   :  { %v771_v33 = vpack.c.bf16 %v769_v31, %v769_v31 }
 0x2ba   :  { %1008 = vmatprep.mubr.bf16.mxu0 %v771_v33 }
 0x2bb   :  { %1009 = vmatmul.mubr.bf16.vlgmr.msra.gmra.mxu0 %v770_v34 }
 0x37b   :  { %v1010_v39 = vpop.f32.mrf.mxu0 }
 0x37c   :  { %v1011_v40 = vadd.f32 %v1010_v39, %v809_v36 }
 0x37d   :  { %v1012_v42 = vpop.f32.mrf.mxu0 }
 0x37e   :  { %v1017_v43 = vmax.f32 %v1011_v40, 0.0  ;;  %v1013_v44 = vadd.f32 %v1012_v42, %v813_v38 }
 0x37f   :  { %v1014_v46 = vpop.f32.mrf.mxu0 }
 0x380   :  { %v1018_v47 = vmax.f32 %v1013_v44, 0.0  ;;  %v1031_v48 = vmul.f32 %v1024_v41, %v1017_v43 }
 0x381   :  { %v1015_v49 = vpop.f32.mrf.mxu0 }
 0x382   :  { %v1032_v50 = vmul.f32 %v1028_v45, %v1018_v47  ;;  %v1034_v51 = vsel %vm1033_vm3, %v1031_v48, 0.0 }
 0x384   :  { %v1035_v52 = vsel %vm1033_vm3, %v1032_v50, 0.0 }
 0x385   :  { %v1036_v53 = vadd.f32 %v1035_v52, %v1034_v51 }
 0x387   :  { %1037 = vadd.xlane.f32.xlu0 %v1036_v53 }
 0x410   :  { %v1038_v55 = vpop.xlane.xlu0 %1037 }
 0x411   :  { %v1046_v56 = vadd.f32 %v1163_v54, %v1038_v55 }
 0x413   :  { %1048 = vst.msk [vmem:[%s1616_s13] sm:$0x3] %vm1047_vm4, %v1046_v56 }
 0x414   :  { %1053 = vsyncpa [#allocation4], 1 }
 0x415   :  { %1054 = vsyncpa [#allocation6], 1 }
 0x416   :  { %1055 = vsyncpa [#allocation9], 1 }
 0x417   :  { %1056 = vsyncpa [#allocation12], 1 }

</bundles_post_ra>
